<compile_context>
chip_gen: v7x
topology: tpu7x:2x2x1
jax: 0.10.0
libtpu: 0.0.40
codegen_flags: <defaults>
</compile_context>

<pallas_src>
import functools

import jax
import jax.numpy as jnp
from jax.experimental import pallas as pl
from jax.experimental.pallas import tpu as pltpu


def _round_up(x, m):
    return -(-x // m) * m


def _sublane(dtype):
    return {4: 8, 2: 16, 1: 32}.get(jnp.dtype(dtype).itemsize, 8)


def _padded_tile_bytes(shape, dtype):
    """VMEM bytes of one block after (sublane, 128-lane) tile padding."""
    itemsize = jnp.dtype(dtype).itemsize
    if len(shape) < 2:
        n = int(shape[0]) if shape else 1
        return _round_up(n, 128) * itemsize
    lead = 1
    for d in shape[:-2]:
        lead *= int(d)
    return (lead * _round_up(int(shape[-2]), _sublane(dtype))
            * _round_up(int(shape[-1]), 128) * itemsize)


def _dwsep_banded_kernel(x_ref, w_ref, b_ref, o_ref, *, kernel_size, tile_h):
    """One (batch block, row tile) per grid step.

    x_ref: (NB, H_pad, W_pad*C_in)       lane-dense padded input (full rows)
    w_ref: (K, W_pad*C_in, W_out*C_out)  banded fused dw*pw*BN-scale weight
    b_ref: (1, W_out*C_out)              folded BN bias (f32)
    o_ref: (NB, tile_h, W_out*C_out)     lane-dense output tile
    """
    nb, _, w_row = x_ref.shape
    n_cols = o_ref.shape[-1]
    k = kernel_size

    row0 = pl.multiple_of(pl.program_id(1) * tile_h, tile_h)

    acc = None
    for kh in range(k):
        # (NB, tile_h, W_pad*C_in) slice of input rows for this tap row.
        lhs = x_ref[:, pl.ds(row0 + kh, tile_h), :]
        part = jnp.dot(lhs.reshape(nb * tile_h, w_row), w_ref[kh],
                       preferred_element_type=jnp.float32)
        acc = part if acc is None else acc + part

    y = jnp.maximum(acc + b_ref[...], 0.0)          # folded BN bias + ReLU (f32)
    o_ref[...] = y.reshape(nb, tile_h, n_cols).astype(o_ref.dtype)


def depthwise_separable_conv_block(x_nchw, dw_w, pw_w, gamma, beta, run_mean,
                                   run_var, *, kernel_size, stride=1, eps=1e-5):
    """x_nchw: (N, C_in, H, W). dw_w: (K, K, C_in). pw_w: (C_in, C_out)."""
    assert stride == 1, "kernel implements stride=1 (module default)"
    n, c_in, h, w = x_nchw.shape
    c_out = pw_w.shape[1]
    k = kernel_size
    x_dtype = x_nchw.dtype

    # ConstantPad2d padding logic from the module.
    padding = k - stride
    if padding % 2 != 0:
        pad_l, pad_r = padding % 2, padding - padding % 2
    else:
        pad_l = pad_r = padding // 2
    pad_t, pad_b = pad_l, pad_r

    h_pad, w_pad = h + pad_t + pad_b, w + pad_l + pad_r
    h_out = (h_pad - k) // stride + 1
    w_out = (w_pad - k) // stride + 1
    w_row = w_pad * c_in
    n_cols = w_out * c_out

    # ---- Fold BN (inference) into scale/bias, then build the width-banded weight.
    scale = gamma.astype(jnp.float32) * jax.lax.rsqrt(
        run_var.astype(jnp.float32) + eps)                          # (C_out,)
    bias = beta.astype(jnp.float32) - run_mean.astype(jnp.float32) * scale
    pw_bn = pw_w.astype(jnp.float32) * scale[None, :]               # (C_in, C_out)

    wp_i = jnp.arange(w_pad)[:, None]                               # (W_pad, 1)
    wo_i = jnp.arange(w_out)[None, :]                               # (1, W_out)
    kw_i = wp_i - wo_i * stride
    valid = ((kw_i >= 0) & (kw_i < k)).astype(jnp.float32)          # (W_pad, W_out)
    kw_c = jnp.clip(kw_i, 0, k - 1)
    # dw_g[kh, wp, wo, ci] = dw[kh, wp-wo, ci] (0 outside the band)
    dw_g = dw_w.astype(jnp.float32)[:, kw_c, :] * valid[None, :, :, None]
    w_banded = jnp.einsum('kpwc,cd->kpcwd', dw_g, pw_bn)            # outer product
    w_banded = w_banded.reshape(k, w_row, n_cols).astype(x_dtype)
    bias_row = jnp.broadcast_to(bias[None, :], (w_out, c_out)).reshape(1, n_cols)

    # ---- Lane-dense padded input: (N, H_pad, W_pad*C_in).
    x = jnp.transpose(x_nchw, (0, 2, 3, 1))                         # NCHW -> NHWC
    x = jnp.pad(x, ((0, 0), (pad_t, pad_b), (pad_l, pad_r), (0, 0)))
    x = x.reshape(n, h_pad, w_row)

    # ---- VMEM budgeting from PADDED tile sizes, per-generation cap.
    try:
        vmem_cap = int(getattr(pltpu.get_tpu_info(), "vmem_capacity_bytes",
                               128 << 20))
    except Exception:
        vmem_cap = 128 << 20
    budget = (40 << 20) if vmem_cap <= (64 << 20) else (64 << 20)

    w_dtype = w_banded.dtype

    def block_bytes(nb, tile_h):
        in_b = 2 * _padded_tile_bytes((nb, h_pad, w_row), x_dtype)
        out_b = 2 * _padded_tile_bytes((nb, tile_h, n_cols), x_dtype)
        w_b = 2 * _padded_tile_bytes((k, w_row, n_cols), w_dtype)
        b_b = 2 * _padded_tile_bytes((1, n_cols), jnp.float32)
        tmp = (_padded_tile_bytes((nb * tile_h, n_cols), jnp.float32)
               + (k + 1) * _padded_tile_bytes((nb * tile_h, w_row), x_dtype))
        return in_b + out_b + w_b + b_b + tmp

    nb = 1
    while nb < min(n, 512) and block_bytes(nb + 1, h_out) <= budget:
        nb += 1
    if n >= 2:                      # guarantee >=2 batch blocks (pipelining / 2 TCs)
        nb = min(nb, (n + 1) // 2)

    batch_blocks = -(-n // nb)
    row_tiles, tile_h = 1, h_out
    if batch_blocks * row_tiles < 4:            # target >=4 steps (>=2 per v7x core)
        for rt in range(2, h_out + 1):
            if h_out % rt or (h_out // rt) % 8:  # keep output block sublane-aligned
                continue
            row_tiles, tile_h = rt, h_out // rt
            if batch_blocks * row_tiles >= 4:
                break

    n_padded = batch_blocks * nb
    if n_padded != n:                           # ragged batch: pad, slice off after
        x = jnp.pad(x, ((0, n_padded - n), (0, 0), (0, 0)))

    need = block_bytes(nb, tile_h)
    vmem_limit = int(min(budget, max(int(1.5 * need) + (2 << 20), 16 << 20)))

    flops = int(2 * n * h_out * w_out * k * k * c_in * c_out)
    bytes_accessed = int(
        (n_padded * h_pad * w_row + n_padded * h_out * n_cols)
        * jnp.dtype(x_dtype).itemsize
        + k * w_row * n_cols * jnp.dtype(w_dtype).itemsize)

    kernel = functools.partial(_dwsep_banded_kernel, kernel_size=k, tile_h=tile_h)

    out = pl.pallas_call(
        kernel,
        out_shape=jax.ShapeDtypeStruct((n_padded, h_out, n_cols), x_dtype),
        grid_spec=pltpu.PrefetchScalarGridSpec(
            num_scalar_prefetch=0,
            grid=(batch_blocks, row_tiles),
            in_specs=[
                pl.BlockSpec((nb, h_pad, w_row), lambda b, r: (b, 0, 0)),
                pl.BlockSpec((k, w_row, n_cols), lambda b, r: (0, 0, 0)),
                pl.BlockSpec((1, n_cols), lambda b, r: (0, 0)),
            ],
            out_specs=pl.BlockSpec((nb, tile_h, n_cols), lambda b, r: (b, r, 0)),
        ),
        compiler_params=pltpu.CompilerParams(
            dimension_semantics=("parallel", "parallel"),
            vmem_limit_bytes=vmem_limit),
        cost_estimate=pl.CostEstimate(flops=flops, transcendentals=0,
                                      bytes_accessed=bytes_accessed),
    )(x, w_banded, bias_row)

    # Undo the lane-dense packing / batch padding and return NCHW.
    out = out[:n].reshape(n, h_out, w_out, c_out)
    return jnp.transpose(out, (0, 3, 1, 2))


def _reference(x_nchw, dw_w, pw_w, gamma, beta, run_mean, run_var, *,
               kernel_size, stride=1, eps=1e-5):
    """Pure-JAX reference with lax.conv (PyTorch OIHW weight convention)."""
    k = kernel_size
    c_in = x_nchw.shape[1]
    padding = k - stride
    if padding % 2 != 0:
        pads = ((padding % 2, padding - padding % 2),) * 2
    else:
        pads = ((padding // 2, padding // 2),) * 2
    w_dw = jnp.transpose(dw_w, (2, 0, 1))[:, None, :, :]        # (C_in,1,K,K)
    y = jax.lax.conv_general_dilated(
        x_nchw.astype(jnp.float32), w_dw.astype(jnp.float32),
        window_strides=(stride, stride), padding=pads,
        feature_group_count=c_in,
        dimension_numbers=("NCHW", "OIHW", "NCHW"),
        precision=jax.lax.Precision.HIGHEST)
    w_pw = jnp.transpose(pw_w, (1, 0))[:, :, None, None]        # (C_out,C_in,1,1)
    y = jax.lax.conv_general_dilated(
        y, w_pw.astype(jnp.float32), window_strides=(1, 1), padding="VALID",
        dimension_numbers=("NCHW", "OIHW", "NCHW"),
        precision=jax.lax.Precision.HIGHEST)
    inv = jax.lax.rsqrt(run_var + eps)
    y = (y - run_mean[None, :, None, None]) * inv[None, :, None, None]
    y = y * gamma[None, :, None, None] + beta[None, :, None, None]
    return jnp.maximum(y, 0.0)


if __name__ == "__main__":
    key = jax.random.PRNGKey(0)
    k1, k2, k3, k4, k5, k6 = jax.random.split(key, 6)

    batch, in_ch, out_ch, ksize, spatial = 2, 4, 8, 3, 16

    x = jax.random.normal(k1, (batch, in_ch, spatial, spatial), jnp.float32)
    dw_w = jax.random.normal(k2, (ksize, ksize, in_ch), jnp.float32) * 0.2
    pw_w = jax.random.normal(k3, (in_ch, out_ch), jnp.float32) * 0.2
    gamma = 1.0 + 0.1 * jax.random.normal(k4, (out_ch,), jnp.float32)
    beta = 0.1 * jax.random.normal(k5, (out_ch,), jnp.float32)
    run_mean = 0.1 * jax.random.normal(k6, (out_ch,), jnp.float32)
    run_var = jnp.ones((out_ch,), jnp.float32)

    out = depthwise_separable_conv_block(
        x, dw_w, pw_w, gamma, beta, run_mean, run_var,
        kernel_size=ksize, stride=1)
    out = jax.block_until_ready(out)

    ref = _reference(x, dw_w, pw_w, gamma, beta, run_mean, run_var,
                     kernel_size=ksize, stride=1)
    assert out.shape == (batch, out_ch, spatial, spatial)
    assert jnp.allclose(out, ref, atol=5e-3, rtol=5e-3), "mismatch vs reference"

    print("KERNEL_OK")
</pallas_src>

<mosaic_0001>
module attributes {stable_mosaic.version = 11 : i64} {
  func.func @_dwsep_banded_kernel(%arg0: i32, %arg1: i32, %arg2: memref<1x18x72xf32, #tpu.memory_space<vmem>>, %arg3: memref<3x72x128xf32, #tpu.memory_space<vmem>>, %arg4: memref<1x128xf32, #tpu.memory_space<vmem>>, %arg5: memref<1x8x128xf32, #tpu.memory_space<vmem>>) attributes {dimension_semantics = [#tpu.dimension_semantics<parallel>, #tpu.dimension_semantics<parallel>], iteration_bounds = array<i64: 2, 2>, scalar_prefetch = 0 : i64, scratch_operands = 0 : i64, tpu.core_type = #tpu.core_type<tc>, window_params = [{transform_indices = @transform_0, window_bounds = array<i64: 1, 18, 72>}, {pipeline_mode = #tpu.pipeline_mode<synchronous>, transform_indices = @transform_1, window_bounds = array<i64: 3, 72, 128>}, {pipeline_mode = #tpu.pipeline_mode<synchronous>, transform_indices = @transform_2, window_bounds = array<i64: 1, 128>}, {transform_indices = @transform_3, window_bounds = array<i64: 1, 8, 128>}]} {
    %c8_i32 = arith.constant 8 : i32
    %0 = arith.muli %arg1, %c8_i32 : i32
    %1 = tpu.assume_multiple %0, 8 : i32
    %c0_i32 = arith.constant 0 : i32
    %2 = arith.addi %1, %c0_i32 : i32
    %c0 = arith.constant 0 : index
    %3 = arith.index_cast %2 : i32 to index
    %c0_0 = arith.constant 0 : index
    %4 = vector.load %arg2[%c0, %3, %c0_0] : memref<1x18x72xf32, #tpu.memory_space<vmem>>, vector<1x8x72xf32>
    %5 = vector.shape_cast %4 : vector<1x8x72xf32> to vector<8x72xf32>
    %c0_1 = arith.constant 0 : index
    %c0_2 = arith.constant 0 : index
    %c0_3 = arith.constant 0 : index
    %6 = vector.load %arg3[%c0_1, %c0_2, %c0_3] : memref<3x72x128xf32, #tpu.memory_space<vmem>>, vector<1x72x128xf32>
    %7 = vector.shape_cast %6 : vector<1x72x128xf32> to vector<72x128xf32>
    %cst = arith.constant dense<0.000000e+00> : vector<8x128xf32>
    %8 = tpu.matmul %5, %7, %cst {dimension_numbers = #tpu.dot_dimension_numbers<[1], [0], [0], [1], [0, 0, 1, 1], [], []>} : vector<8x72xf32>, vector<72x128xf32>, vector<8x128xf32> -> vector<8x128xf32>
    %c1_i32 = arith.constant 1 : i32
    %9 = arith.addi %1, %c1_i32 : i32
    %c0_4 = arith.constant 0 : index
    %10 = arith.index_cast %9 : i32 to index
    %c0_5 = arith.constant 0 : index
    %11 = vector.load %arg2[%c0_4, %10, %c0_5] : memref<1x18x72xf32, #tpu.memory_space<vmem>>, vector<1x8x72xf32>
    %12 = vector.shape_cast %11 : vector<1x8x72xf32> to vector<8x72xf32>
    %c1 = arith.constant 1 : index
    %c0_6 = arith.constant 0 : index
    %c0_7 = arith.constant 0 : index
    %13 = vector.load %arg3[%c1, %c0_6, %c0_7] : memref<3x72x128xf32, #tpu.memory_space<vmem>>, vector<1x72x128xf32>
    %14 = vector.shape_cast %13 : vector<1x72x128xf32> to vector<72x128xf32>
    %cst_8 = arith.constant dense<0.000000e+00> : vector<8x128xf32>
    %15 = tpu.matmul %12, %14, %cst_8 {dimension_numbers = #tpu.dot_dimension_numbers<[1], [0], [0], [1], [0, 0, 1, 1], [], []>} : vector<8x72xf32>, vector<72x128xf32>, vector<8x128xf32> -> vector<8x128xf32>
    %16 = arith.addf %8, %15 : vector<8x128xf32>
    %c2_i32 = arith.constant 2 : i32
    %17 = arith.addi %1, %c2_i32 : i32
    %c0_9 = arith.constant 0 : index
    %18 = arith.index_cast %17 : i32 to index
    %c0_10 = arith.constant 0 : index
    %19 = vector.load %arg2[%c0_9, %18, %c0_10] : memref<1x18x72xf32, #tpu.memory_space<vmem>>, vector<1x8x72xf32>
    %20 = vector.shape_cast %19 : vector<1x8x72xf32> to vector<8x72xf32>
    %c2 = arith.constant 2 : index
    %c0_11 = arith.constant 0 : index
    %c0_12 = arith.constant 0 : index
    %21 = vector.load %arg3[%c2, %c0_11, %c0_12] : memref<3x72x128xf32, #tpu.memory_space<vmem>>, vector<1x72x128xf32>
    %22 = vector.shape_cast %21 : vector<1x72x128xf32> to vector<72x128xf32>
    %cst_13 = arith.constant dense<0.000000e+00> : vector<8x128xf32>
    %23 = tpu.matmul %20, %22, %cst_13 {dimension_numbers = #tpu.dot_dimension_numbers<[1], [0], [0], [1], [0, 0, 1, 1], [], []>} : vector<8x72xf32>, vector<72x128xf32>, vector<8x128xf32> -> vector<8x128xf32>
    %24 = arith.addf %16, %23 : vector<8x128xf32>
    %c0_14 = arith.constant 0 : index
    %c0_15 = arith.constant 0 : index
    %25 = vector.load %arg4[%c0_14, %c0_15] : memref<1x128xf32, #tpu.memory_space<vmem>>, vector<1x128xf32>
    %26 = vector.broadcast %25 : vector<1x128xf32> to vector<8x128xf32>
    %27 = arith.addf %24, %26 : vector<8x128xf32>
    %cst_16 = arith.constant 0.000000e+00 : f32
    %28 = vector.broadcast %cst_16 : f32 to vector<8x128xf32>
    %29 = arith.maximumf %27, %28 : vector<8x128xf32>
    %30 = vector.shape_cast %29 : vector<8x128xf32> to vector<1x8x128xf32>
    %c0_17 = arith.constant 0 : index
    %c0_18 = arith.constant 0 : index
    %c0_19 = arith.constant 0 : index
    %31 = vector.load %arg5[%c0_17, %c0_18, %c0_19] : memref<1x8x128xf32, #tpu.memory_space<vmem>>, vector<1x8x128xf32>
    tpu.vector_store %arg5[%c0_17, %c0_18, %c0_19], %30 {strides = array<i32>} : memref<1x8x128xf32, #tpu.memory_space<vmem>>, vector<1x8x128xf32>,
    return
  }
  func.func @transform_0(%arg0: i32, %arg1: i32) -> (i32, i32, i32) {
    %c0_i32 = arith.constant 0 : i32
    %c0_i32_0 = arith.constant 0 : i32
    %c0_i32_1 = arith.constant 0 : i32
    return %arg0, %c0_i32, %c0_i32_0 : i32, i32, i32
  }
  func.func @transform_1(%arg0: i32, %arg1: i32) -> (i32, i32, i32) {
    %c0_i32 = arith.constant 0 : i32
    %c0_i32_0 = arith.constant 0 : i32
    %c0_i32_1 = arith.constant 0 : i32
    %c0_i32_2 = arith.constant 0 : i32
    return %c0_i32, %c0_i32_0, %c0_i32_1 : i32, i32, i32
  }
  func.func @transform_2(%arg0: i32, %arg1: i32) -> (i32, i32) {
    %c0_i32 = arith.constant 0 : i32
    %c0_i32_0 = arith.constant 0 : i32
    %c0_i32_1 = arith.constant 0 : i32
    return %c0_i32, %c0_i32_0 : i32, i32
  }
  func.func @transform_3(%arg0: i32, %arg1: i32) -> (i32, i32, i32) {
    %c0_i32 = arith.constant 0 : i32
    %c0_i32_0 = arith.constant 0 : i32
    return %arg0, %arg1, %c0_i32 : i32, i32, i32
  }
}

</mosaic_0001>

<bundles_post_ra>
// kernel: tpu_custom_call.1
= control target key start
LH: loop header
LB: loop body
LE: loop exit
PB: predicated region body
PF: predicated region fallthrough
CT: control target
= control target key end

     0   :  { %8 = vsyncpa [#allocation3], 0  ;;  %s1176_s0 = inlined_call_operand.vmem [shape: f32[2,18,72], index: 0, kind: input, shape index: {}]   ;;  %s1177_s1 = inlined_call_operand.hbm [shape: f32[3,72,128], index: 1, kind: input, shape index: {}]   ;;  %s1178_s2 = inlined_call_operand.vmem [shape: f32[1,128], index: 2, kind: input, shape index: {}]   ;;  %s1179_s3 = inlined_call_operand.hbm [shape: f32[2,16,128], index: 3, kind: output, shape index: {}]  }
   0x1   :  { %9 = vsyncpa [#allocation4], 0 }
   0x2   :  { %11 = vsyncpa [#allocation4 + $0x1], 0  ;;  %s970_s12 = smov 0   ;;  %s972_s13 = smov 0  }
   0x3   :  { %s974_s14 = smov 0   ;;  %s976_s15 = smov 0  }
   0x4   :  { %s978_s16 = smov 0   ;;  %s980_s17 = smov 0  }
   0x5   :  { %s982_s18 = smov 0   ;;  %s984_s19 = smov 0  }
   0x6 LB: > { %s575_s20 = sadd.s32 4294967295, %s941_s19   ;;  %s576_s21 = sadd.s32 4294967294, %s941_s19   ;;  %s941_s19 = sphi %s984_s19, %s17_s19   ;;  %s937_s18 = sphi %s982_s18, %s1199_s18   ;;  %s933_s17 = sphi %s980_s17, %s1198_s17   ;;  %s929_s16 = sphi %s978_s16, %s1197_s16   ;;  %s925_s15 = sphi %s976_s15, %s1196_s15   ;;  %s921_s14 = sphi %s974_s14, %s1195_s14   ;;  %s917_s13 = sphi %s972_s13, %s1194_s13   ;;  %s913_s12 = sphi %s970_s12, %s1193_s12  }
   0x7   : > { %s26_s22 = sadd.s32 1, %s933_s17  ;;  %s29_s23 = sadd.s32 1, %s937_s18 }
   0x8   : > { %p27_p0 = scmp.ge.s32.totalorder %s26_s22, 2  ;;  %s106_s24 = sadd.s32 1, %s921_s14 }
   0x9   : > { %p116_p1 = scmp.ne.s32.totalorder %s921_s14, %s917_s13  ;;  %p117_p2 = scmp.eq.s32.totalorder %s575_s20, 3 }
   0xa   : > { %s1201_s22 = smov (%p27_p0, %s26_s22), 0  ;;  %s1203_s23 = smov (!%p27_p0, %s29_s23), %s937_s18 }
   0xb   : > { %s102_s25 = ssub.s32 %s933_s17, %s1201_s22  ;;  %p1022_p3 = por %p117_p2, %p116_p1 }
   0xc   : > { %p31_p4 = scmp.ge.s32.totalorder %s1203_s23, 2  ;;  %p122_p5 = scmp.ne.s32.totalorder %s917_s13, %s913_s12 }
   0xd   : > { %s1184_s26 = scalar_select %p1022_p3, 1, 0 }
   0xe   : > { %p123_p6 = scmp.eq.s32.totalorder %s576_s21, 3  ;;  %p577_p7 = scmp.ge.s32.totalorder %s941_s19, 1 }
   0xf   : > { %s1205_s23 = smov (%p31_p4, %s1203_s23), 0  ;;  %p130_p9 = scmp.lt.s32.totalorder %s941_s19, 5 }
  0x10   : > { %p1031_p8 = por %p123_p6, %p122_p5  ;;  %s101_s28 = ssub.s32 %s937_s18, %s1205_s23 }
  0x11   : > { %s103_s29 = sor.u32 %s102_s25, %s101_s28  ;;  %p1038_p10 = pnand %p577_p7, %p130_p9 }
  0x12   : > { %s1185_s27 = scalar_select %p1031_p8, 1, 0 }
  0x13   : > { %s1186_s30 = scalar_select %p1038_p10, 1, 0 }
  0x14   : > { %p104_p11 = scmp.eq.s32.totalorder %s103_s29, 0  ;;  %p1042_p12 = scmp.eq.s32.totalorder %s575_s20, 0 }
  0x15   : > { %p734_p13 = pneg %p1038_p10  ;;  %s943_s6 = smov [#allocation2]  }
  0x16   : > { %s1187_s4 = scalar_select %p1042_p12, 1, 0 }
  0x17   : > { %s1049_s5 = scalar_select %p104_p11, %s921_s14, %s106_s24  }
  0x18   : > { %s142_s7 = sshll.u32 %s943_s6, 4  ;;  %p1053_p0 = pnand %p1042_p12, %p734_p13  ;;  %s143_s7 = int_to_ptr.vmem [resolvable:$true] %s142_s7 }
  0x19   : > { %s815_s11 = scalar_lea.hbm %s1177_s1, 3456 }
  0x1a   : > { %p816_p1 = scmp.ne.s32.totalorder %s1177_s1, %s815_s11  ;;  %p817_p2 = pneg %p1053_p0 }
  0x1b   : > { %p822_p6 = scmp.lt.u32.totalorder %s815_s11, %s1177_s1 }
  0x1c   : > { %p818_p4 = pnand %p817_p2, %p816_p1 }
  0x1e   : > { %p819_p5 = pneg %p818_p4 }
  0x20   : > { %p824_p7 = pnand %p822_p6, %p819_p5 }
  0x22   : > { %827 = shalt.err (!%p824_p7)
}
  0x23   : > { %s828_s28 = scalar_lea.vmem %s143_s7, 3456  ;;  %p836_p8 = scmp.lt.s32.totalorder %s143_s7, %s143_s7 }
  0x24   : > { %p829_p9 = scmp.ne.s32.totalorder %s143_s7, %s828_s28  ;;  %p837_p3 = scmp.lt.s32.totalorder %s828_s28, %s828_s28 }
  0x26   : > { %p831_p11 = pnand %p829_p9, %p817_p2  ;;  %p838_p12 = por %p837_p3, %p836_p8 }
  0x28   : > { %p832_p13 = pneg %p831_p11 }
  0x2a   : > { %p839_p10 = pnand %p838_p12, %p832_p13 }
  0x2c   : > { %842 = shalt.err (!%p839_p10)
}
  0x2d   : > { %s944_s29 = smov 128   ;;  %s945_s6 = smov 8  }
  0x2e   : > { %737 = dma.hbm_to_vmem [thread:$0]  (!%p1053_p0), %s1177_s1, 3456, %s143_s7, [#allocation3], %s944_s29, %s944_s29, %s945_s6  }
  0x2f   : > { %p1189_p1 = scmp.ne.s32.totalorder %s1186_s30, 0 }
  0x30   : > { %p1190_p4 = scmp.ne.s32.totalorder (!%p1189_p1), %s1187_s4, 0 }
  0x31   : > { %169 = sbr.rel (%p1189_p1) target bundleno = 329 (0x149), region = 32 }
  0x38   : > { %904 = dma.done.wait (%p1190_p4), [#allocation3], 3456  }
  0x39   : > { %906 = vsyncadd (%p1190_p4), [#allocation3], 4294963840  ;;  %v946_v0 = vmov 0.0|0.0   ;;  %vm947_vm0 = vmmov 0   ;;  %v948_v1 = vmov 0.0   ;;  %p193_p3 = scmp.lt.s32.totalorder %s929_s16, 1 }
  0x3a   : > { %691 = vmatprep.subr.bf16.mxu0 %v946_v0  ;;  %703 = vmatprep.subr.bf16.mxu1 %v946_v0  ;;  %v214_v2 = vld [vmem:[#allocation2 + $0x48] sm:$0xff]  ;;  %v215_v3 = vld [vmem:[#allocation2 + $0x50] sm:$0xff]  ;;  %v201_v4 = vld [vmem:[#allocation2] sm:$0xff]  ;;  %s584_s20 = sshll.u32 %s925_s15, 3  ;;  %vm223_vm1 = vcmask 588800   ;;  %s190_s24 = sand.u32 1, %s917_s13  }
  0x3b   : > { %646 = vmatprep.mubr.msk.f32.mxu0 %vm947_vm0, %v948_v1  ;;  %667 = vmatprep.mubr.msk.f32.mxu1 %vm947_vm0, %v948_v1  ;;  %v692_v5 = vpack.c.bf16 %v215_v3, %v214_v2  ;;  %v202_v6 = vld [vmem:[#allocation2 + $0x8] sm:$0xff]  ;;  %v216_v7 = vld [vmem:[#allocation2 + $0x58] sm:$0xff]  ;;  %v217_v8 = vld [vmem:[#allocation2 + $0x60] sm:$0xff]  ;;  %s194_s30 = scalar_select %p193_p3, %s929_s16, 1 }
  0x3c   : > { %v704_v9 = vpack.c.bf16 %v202_v6, %v201_v4  ;;  %v203_v10 = vld [vmem:[#allocation2 + $0x10] sm:$0xff]  ;;  %v204_v11 = vld [vmem:[#allocation2 + $0x18] sm:$0xff]  ;;  %v695_v12 = vpack.c.bf16 %v217_v8, %v216_v7  ;;  %v218_v14 = vld [vmem:[#allocation2 + $0x68] sm:$0xff]  ;;  %s582_s25 = sshll.u32 %s190_s24, 3  ;;  %s594_s28 = sshll.u32 %s929_s16, 1 }
  0x3d   : > { %693 = vmatpush3.bf16.msra.mxu0 %v692_v5  ;;  %v707_v13 = vpack.c.bf16 %v204_v11, %v203_v10  ;;  %v219_v15 = vld [vmem:[#allocation2 + $0x70] sm:$0xff]  ;;  %v205_v16 = vld [vmem:[#allocation2 + $0x20] sm:$0xff]  ;;  %v206_v17 = vld [vmem:[#allocation2 + $0x28] sm:$0xff]  ;;  %s727_s4 = smul.u32 24, %s194_s30  ;;  %s479_s29 = sadd.s32 %s925_s15, %s594_s28 }
  0x3e   : > { %705 = vmatpush3.bf16.msra.mxu1 %v704_v9  ;;  %694 = vmatprep.subr.bf16.mxu0 %v946_v0  ;;  %v698_v18 = vpack.c.bf16 %v219_v15, %v218_v14  ;;  %v710_v19 = vpack.c.bf16 %v206_v17, %v205_v16  ;;  %v220_v20 = vld [vmem:[#allocation2 + $0x78] sm:$0xff]  ;;  %v221_v21 = vld [vmem:[#allocation2 + $0x80] sm:$0xff]  ;;  %v207_v22 = vld [vmem:[#allocation2 + $0x30] sm:$0xff]  ;;  %s595_s10 = sshll.u32 %s479_s29, 7  ;;  %s192_s30 = scalar_lea.vmem [#allocation5], %s582_s25 }
  0x3f   : > { %706 = vmatprep.subr.bf16.mxu1 %v946_v0  ;;  %v208_v23 = vld [vmem:[#allocation2 + $0x38] sm:$0xff]  ;;  %v701_v24 = vpack.c.bf16 %v221_v21, %v220_v20  ;;  %s197_s11 = scalar_lea.vmem %s1176_s0, %s727_s4  ;;  %v374_v26 = vld [vmem:[#allocation2 + $0x90] sm:$0xff]  ;;  %v222_v28 = vld [vmem:[#allocation2 + $0x88] sm:$0xff]  ;;  %s483_s4 = sshll.u32 %s192_s30, 4  ;;  %s1125_s4 = int_to_ptr.vmem [resolvable:$true] %s483_s4 }
  0x40   : > { %v713_v25 = vpack.c.bf16 %v208_v23, %v207_v22  ;;  %s1097_s21 = scalar_lea.vmem %s197_s11, %s584_s20  ;;  %v375_v27 = vld [vmem:[#allocation2 + $0x98] sm:$0xff]  ;;  %v209_v30 = vld [vmem:[#allocation2 + $0x40] sm:$0xff]  ;;  %v377_v34 = vld [vmem:[#allocation2 + $0xa8] sm:$0xff]  ;;  %s1123_s11 = scalar_lea.hbm %s1179_s3, %s595_s10 }
  0x41   : > { %696 = vmatpush3.bf16.msra.mxu0 %v695_v12  ;;  %v586_v29 = vld [vmem:[%s1097_s21 + $0x1] sm:$0xff]  ;;  %v716_v32 = vpack.c.bf16 %v375_v27, %v374_v26  ;;  %v376_v33 = vld [vmem:[#allocation2 + $0xa0] sm:$0xff]  ;;  %v381_v40 = vld [vmem:[#allocation2 + $0xc8] sm:$0xff]  ;;  %s468_s15 = scalar_lea.sflag [#allocation4], %s190_s24  ;;  %s843_s16 = scalar_lea.vmem %s1125_s4, 128 }
  0x42   : > { %708 = vmatpush3.bf16.msra.mxu1 %v707_v13  ;;  %697 = vmatprep.subr.bf16.mxu0 %v946_v0  ;;  %v200_v31 = vld [vmem:[%s1097_s21] sm:$0xff]  ;;  %v719_v35 = vpack.c.bf16 %v377_v34, %v376_v33  ;;  %v379_v37 = vld [vmem:[#allocation2 + $0xb8] sm:$0xff]  ;;  %v380_v39 = vld [vmem:[#allocation2 + $0xc0] sm:$0xff]  ;;  %p844_p8 = scmp.ne.s32.totalorder %s1125_s4, %s843_s16  ;;  %p1191_p10 = scmp.ne.s32.totalorder %s1184_s26, 0 }
  0x43   : > { %709 = vmatprep.subr.bf16.mxu1 %v946_v0  ;;  %v378_v36 = vld [vmem:[#allocation2 + $0xb0] sm:$0xff]  ;;  %v725_v41 = vpack.c.bf16 %v381_v40, %v380_v39  ;;  %s949_s20 = smov [#allocation5]  }
  0x44   : > { %v722_v38 = vpack.c.bf16 %v379_v37, %v378_v36  ;;  %v382_v42 = vld [vmem:[#allocation2 + $0xd0] sm:$0xff]  ;;  %p845_p12 = pnand %p844_p8, %p1191_p10 }
  0x45   : > { %699 = vmatpush3.bf16.msra.mxu0 %v698_v18  ;;  %v590_v43 = vld [vmem:[%s1097_s21 + $0x2] sm:$0xff]  ;;  %v592_v50 = vld [vmem:[%s1178_s2] ss:$0 sm:$0xff]  ;;  %s847_s21 = sshll.u32 %s949_s20, 4  ;;  %s848_s21 = int_to_ptr.vmem [resolvable:$false] %s847_s21 }
  0x46   : > { %711 = vmatpush3.bf16.msra.mxu1 %v710_v19  ;;  %700 = vmatprep.subr.bf16.mxu0 %v946_v0  ;;  %p846_p0 = pneg %p845_p12  ;;  %s849_s25 = scalar_lea.vmem %s848_s21, 256 }
  0x47   : > { %712 = vmatprep.subr.bf16.mxu1 %v946_v0  ;;  %p850_p2 = scmp.lt.s32.totalorder %s1125_s4, %s848_s21  ;;  %p851_p5 = scmp.lt.s32.totalorder %s849_s25, %s843_s16 }
  0x49   : > { %702 = vmatpush3.bf16.msra.mxu0 %v701_v24  ;;  %p852_p6 = por %p851_p5, %p850_p2 }
  0x4a   : > { %714 = vmatpush3.bf16.msra.mxu1 %v713_v25  ;;  %644 = vmatprep.subr.mxu0 %v948_v1 }
  0x4b   : > { %665 = vmatprep.subr.mxu1 %v948_v1  ;;  %p853_p7 = pnand %p852_p6, %p846_p0 }
  0x4d   : > { %645 = vmatpush3.msra.mxu0 %v222_v28 }
  0x4e   : > { %647 = vmatmul.mubr.msk.f32.vlgmr.msra.gmra.mrb[0].mxu0 %vm223_vm1, %v586_v29  ;;  %666 = vmatpush3.msra.mxu1 %v209_v30 }
  0x4f   : > { %715 = vmatprep.subr.bf16.mxu0 %v946_v0  ;;  %668 = vmatmul.mubr.msk.f32.vlgmr.msra.gmra.mrb[0].mxu1 %vm223_vm1, %v200_v31 }
  0x50   : > { %717 = vmatpush3.bf16.msra.mxu0 %v716_v32  ;;  %688 = vmatprep.mubr.msk.f32.mxu0 %vm947_vm0, %v948_v1 }
  0x51   : > { %718 = vmatprep.subr.bf16.mxu0 %v946_v0 }
  0x54   : > { %720 = vmatpush3.bf16.msra.mxu0 %v719_v35 }
  0x55   : > { %721 = vmatprep.subr.bf16.mxu0 %v946_v0 }
  0x58   : > { %723 = vmatpush3.bf16.msra.mxu0 %v722_v38 }
  0x59   : > { %724 = vmatprep.subr.bf16.mxu0 %v946_v0 }
  0x5c   : > { %726 = vmatpush3.bf16.msra.mxu0 %v725_v41 }
  0x5d   : > { %686 = vmatprep.subr.mxu0 %v948_v1 }
  0x60   : > { %687 = vmatpush3.msra.mxu0 %v382_v42 }
  0x61   : > { %689 = vmatmul.mubr.msk.f32.vlgmr.msra.gmra.mrb[2].mxu0 %vm223_vm1, %v590_v43 }
 0x121   : > { %v293_v44 = vpop.f32.mrb[0].mxu0 }
 0x122   : > { %v648_v45 = vpop.f32.mrb[1].mxu0  ;;  %v366_v46 = vpop.f32.mrb[0].mxu1 }
 0x123   : > { %v367_v47 = vadd.f32 %v366_v46, %v293_v44  ;;  %v669_v48 = vpop.f32.mrb[1].mxu1 }
 0x134   : > { %v452_v49 = vpop.f32.mrb[2].mxu0 }
 0x135   : > { %v456_v51 = vadd.f32 %v452_v49, %v367_v47  ;;  %v690_v52 = vpop.f32.mrb[3].mxu0 }
 0x137   : > { %v464_v53 = vadd.f32 %v592_v50, %v456_v51 }
 0x139   : > { %v465_v54 = vmax.f32 %v464_v53, 0.0 }
 0x13b   : > { %466 = vst [vmem:[%s192_s30] sm:$0xff] %v465_v54 }
 0x13c   : > { %856 = shalt.err (!%p853_p7)
}
 0x13d   : > { %s857_s24 = scalar_lea.hbm %s1123_s11, 128  ;;  %s861_s6 = scalar_lea.hbm %s1179_s3, 512 }
 0x13e   : > { %p858_p9 = scmp.ne.s32.totalorder %s1123_s11, %s857_s24  ;;  %p862_p1 = scmp.lt.u32.totalorder %s1123_s11, %s1179_s3 }
 0x13f   : > { %p863_p4 = scmp.lt.u32.totalorder %s861_s6, %s857_s24  ;;  %p865_p8 = scmp.lt.u32.totalorder %s857_s24, %s1123_s11 }
 0x140   : > { %p859_p11 = pnand %p858_p9, %p1191_p10 }
 0x141   : > { %p864_p3 = por %p863_p4, %p862_p1 }
 0x142   : > { %p860_p13 = pneg %p859_p11 }
 0x143   : > { %p866_p12 = por %p865_p8, %p864_p3 }
 0x145   : > { %p867_p0 = pnand %p866_p12, %p860_p13 }
 0x147   : > { %870 = shalt.err (!%p867_p0)
}
 0x148   : > { %732 = dma.vmem_to_hbm [thread:$0]  (%p1191_p10), %s1125_s4, 128, %s1123_s11, %s468_s15  }
 0x149 PF: > { %p744_p2 = scmp.ge.s32.totalorder %s941_s19, 2  ;;  %s495_s30 = sand.u32 1, %s913_s12  }
 0x14a   : > { %p1192_p5 = scmp.ne.s32.totalorder %s1185_s27, 0  ;;  %s496_s7 = scalar_lea.sflag [#allocation4], %s495_s30 }
 0x14c   : > { %p739_p6 = pnand %p744_p2, %p1192_p5 }
 0x14e   : > { %908 = dma.done.wait (!%p739_p6), %s496_s7, 128  }
 0x14f   : > { %910 = vsyncadd (!%p739_p6), %s496_s7, 4294967168  ;;  %s17_s19 = sadd.s32 1, %s941_s19   ;;  %s1193_s12 = smov %s917_s13 }
 0x150   : > { %p14_p7 = scmp.ge.s32.totalorder %s17_s19, 6   ;;  %s1194_s13 = smov %s921_s14 }
 0x151   : > { %s1195_s14 = smov %s1049_s5  ;;  %s1196_s15 = smov %s933_s17 }
 0x152   : > { %s1197_s16 = smov %s937_s18  ;;  %s1198_s17 = smov %s1201_s22 }
 0x153   : > { %s1199_s18 = smov %s1205_s23  ;;  %16 = sbr.rel (!%p14_p7) target bundleno = 6 (0x6), region = 77 }
 0x15a   :  { %501 = vsyncpa [#allocation3], 1 }
 0x15b   :  { %503 = vsyncpa [#allocation3 + $0x1], 1 }
 0x15c   :  { %504 = vsyncpa [#allocation4], 1 }
 0x15d   :  { %506 = vsyncpa [#allocation4 + $0x1], 1 }

</bundles_post_ra>
